<compile_context>
chip_gen: v7x
topology: tpu7x:2x2x1
jax: 0.10.0
libtpu: 0.0.40
codegen_flags: <defaults>
</compile_context>

<pallas_src>
import jax
import jax.numpy as jnp
from jax.experimental import pallas as pl
from jax.experimental.pallas import tpu as pltpu

LANE = 128         # lane width: feature dims padded to this
SUBLANE = 8        # f32 sublane group (packed bias operand rows)
BATCH_ALIGN = 16   # bf16 sublane packing -> batch tiles kept multiples of 16

# Flipped to False at runtime if this JAX build rejects pl.Buffered(1) on
# resident (constant index_map) operands.
_SINGLE_BUFFER_WEIGHTS = True


def _round_up(n, m):
    return ((n + m - 1) // m) * m


def _pad2d(a, rows, cols):
    return jnp.pad(a, ((0, rows - a.shape[0]), (0, cols - a.shape[1])))


# ---------------------------------------------------------------------------
# Fused whole-network kernel
# ---------------------------------------------------------------------------
def _make_fused_mlp_kernel(n_hidden):
    """kernel(x, [w_l, b_l] * n_hidden, w_head, b_head, out).

    w_l: bf16 (in_pad, out_pad) transposed weight with the PREVIOUS layer's
         BatchNorm affine folded in.
    b_l: f32 (8, out_pad); row 0 holds the (BN-shift-folded) bias.
    All matmul accumulation is f32; activations are bf16 only at the MXU input.
    """
    def kernel(*refs):
        x_ref = refs[0]
        o_ref = refs[-1]
        h = x_ref[...]                                   # (TB, in_pad) bf16
        idx = 1
        for _ in range(n_hidden):
            w_ref, b_ref = refs[idx], refs[idx + 1]
            idx += 2
            y = jnp.dot(h, w_ref[...], preferred_element_type=jnp.float32)
            # bias (+ folded BN shift of previous layer) then ReLU; this
            # layer's BN scale/shift live inside the NEXT layer's operands.
            h = jnp.maximum(y + b_ref[0:1, :], 0.0).astype(jnp.bfloat16)
            # Dropout: identity in eval mode.
        w_ref, b_ref = refs[idx], refs[idx + 1]
        y = jnp.dot(h, w_ref[...], preferred_element_type=jnp.float32)
        o_ref[...] = y + b_ref[0:1, :]                   # classifier head (f32 out)
    return kernel


# ---------------------------------------------------------------------------
# One-time parameter preparation (transpose, BN->next-layer fold, pad, bf16)
# ---------------------------------------------------------------------------
def prepare_params(hidden_params, head_params, eps=1e-5):
    """Fold each BatchNorm1d (eval) into the FOLLOWING linear layer:
        scale_l = gamma_l / sqrt(var_l + eps)
        shift_l = beta_l - mean_l * scale_l
        W_{l+1}' = scale_l[:, None] * W_{l+1}.T
        b_{l+1}' = b_{l+1} + shift_l @ W_{l+1}.T
    (the last hidden layer's BN folds into the head).  Weights are transposed,
    zero-padded to 128-lane multiples and cast to bf16 (MXU-native); biases are
    packed as row 0 of an (8, F_pad) f32 operand.
    """
    prepared_hidden = []
    carry_scale = None
    carry_shift = None

    for p in hidden_params:
        out_d, in_d = p["w"].shape
        wt = p["w"].T.astype(jnp.float32)                # (in_d, out_d)
        b = p["b"].astype(jnp.float32)
        if carry_scale is not None:
            b = b + carry_shift @ wt                     # uses UN-scaled weight
            wt = wt * carry_scale[:, None]
        scale = (p["gamma"] / jnp.sqrt(p["var"] + eps)).astype(jnp.float32)
        shift = (p["beta"] - p["mean"] * scale).astype(jnp.float32)
        carry_scale, carry_shift = scale, shift

        in_pad, out_pad = _round_up(in_d, LANE), _round_up(out_d, LANE)
        w_op = _pad2d(wt, in_pad, out_pad).astype(jnp.bfloat16)
        b_op = jnp.zeros((SUBLANE, out_pad), jnp.float32).at[0, :out_d].set(b)
        prepared_hidden.append((w_op, b_op))

    w_out, b_out = head_params
    out_d, in_d = w_out.shape
    wt = w_out.T.astype(jnp.float32)
    b = b_out.astype(jnp.float32)
    if carry_scale is not None:
        b = b + carry_shift @ wt
        wt = wt * carry_scale[:, None]
    in_pad, out_pad = _round_up(in_d, LANE), _round_up(out_d, LANE)
    w_op = _pad2d(wt, in_pad, out_pad).astype(jnp.bfloat16)
    b_op = jnp.zeros((SUBLANE, out_pad), jnp.float32).at[0, :out_d].set(b)
    return prepared_hidden, (w_op, b_op), out_d


# ---------------------------------------------------------------------------
# VMEM sizing helpers (per-generation: 128 MiB v5e/v6e, 64 MiB v7x)
# ---------------------------------------------------------------------------
def _vmem_capacity_bytes():
    try:
        return int(pltpu.get_tpu_info().vmem_capacity_bytes)
    except Exception:
        return 64 * 1024 * 1024   # conservative fallback (v7x per-TC)


def _estimate_live_vmem(tb, in_pad, out_pad, feat_pads, weight_resident_bytes):
    """Rough upper bound on resident VMEM (bytes) for a given batch tile."""
    io = 2 * tb * in_pad * 2 + 2 * tb * out_pad * 4      # 2x-buffered x (bf16) + out (f32)
    widest = max(feat_pads) if feat_pads else out_pad
    act = 2 * tb * widest * (4 + 2)                      # f32 acc + bf16 copy, 2x headroom
    return io + act + weight_resident_bytes


# ---------------------------------------------------------------------------
# Pallas-backed forward pass (single kernel launch)
# ---------------------------------------------------------------------------
def mlp_classifier_forward(x, prepared_hidden, prepared_head, output_dim,
                           *, batch_tile=None):
    global _SINGLE_BUFFER_WEIGHTS

    batch, in_d = x.shape
    n_hidden = len(prepared_hidden)
    in_pad = prepared_hidden[0][0].shape[0] if n_hidden else prepared_head[0].shape[0]
    out_pad = prepared_head[0].shape[1]
    feat_pads = [w.shape[1] for w, _ in prepared_hidden] + [out_pad]

    weight_ops = []
    for w, b in prepared_hidden:
        weight_ops += [w, b]
    weight_ops += [prepared_head[0], prepared_head[1]]
    weight_nbytes = sum(int(op.size) * op.dtype.itemsize for op in weight_ops)
    weight_resident_budget = 2 * weight_nbytes           # budget 2x in case of double-buffering

    vmem_cap = _vmem_capacity_bytes()
    vmem_budget = int(0.875 * vmem_cap)                  # ~112 MiB (128 MiB parts), ~56 MiB (v7x)

    if batch_tile is None:
        batch_tile = 512 if vmem_cap >= 100 * 1024 * 1024 else 256

    # >= 2 grid steps whenever the batch allows it (v7x megacore); tile sized
    # adaptively so awkward batch sizes are not over-padded by up to tb-1 rows.
    n_tiles = max(2, pl.cdiv(batch, batch_tile))
    tb = min(batch_tile,
             max(BATCH_ALIGN, _round_up(pl.cdiv(batch, n_tiles), BATCH_ALIGN)))
    # Shrink the batch tile (never the pipeline depth) if the live set would
    # overflow the per-generation VMEM budget (matters on v7x's 64 MiB).
    while tb > 128 and _estimate_live_vmem(
            tb, in_pad, out_pad, feat_pads, weight_resident_budget) > vmem_budget:
        tb = max(128, _round_up(tb // 2, BATCH_ALIGN))

    n_steps = pl.cdiv(batch, tb)
    b_pad = n_steps * tb

    # bf16 input streaming halves the dominant HBM read at large batch.
    x_pad = jnp.pad(x.astype(jnp.bfloat16),
                    ((0, b_pad - batch), (0, in_pad - in_d)))

    kernel = _make_fused_mlp_kernel(n_hidden)
    operands = [x_pad] + weight_ops

    flops = 2 * b_pad * sum(int(w.shape[0]) * int(w.shape[1])
                            for w, _ in prepared_hidden)
    flops += 2 * b_pad * int(prepared_head[0].shape[0]) * int(prepared_head[0].shape[1])
    bytes_accessed = int(x_pad.size) * 2 + b_pad * out_pad * 4 + weight_nbytes
    cost = pl.CostEstimate(flops=int(flops), transcendentals=0,
                           bytes_accessed=int(bytes_accessed))

    compiler_params = pltpu.CompilerParams(
        dimension_semantics=("parallel",),   # megacore sharding of batch tiles on v7x
        vmem_limit_bytes=vmem_budget,
    )

    def run(single_buffer_weights):
        # Weights/biases never change across grid steps (index_map == (0, 0));
        # request a single VMEM buffer for them instead of double-buffering.
        wkw = dict(pipeline_mode=pl.Buffered(1)) if single_buffer_weights else {}
        in_specs = [pl.BlockSpec((tb, in_pad), lambda i: (i, 0))]
        for op in weight_ops:
            in_specs.append(pl.BlockSpec(op.shape, lambda i: (0, 0), **wkw))
        return pl.pallas_call(
            kernel,
            out_shape=jax.ShapeDtypeStruct((b_pad, out_pad), jnp.float32),
            grid=(n_steps,),
            in_specs=in_specs,
            out_specs=pl.BlockSpec((tb, out_pad), lambda i: (i, 0)),
            compiler_params=compiler_params,
            cost_estimate=cost,
        )(*operands)

    if _SINGLE_BUFFER_WEIGHTS:
        try:
            out = run(True)
        except Exception:
            # This JAX build rejects pl.Buffered(1) on resident operands; fall
            # back to default buffering (2x weight VMEM already budgeted).
            _SINGLE_BUFFER_WEIGHTS = False
            out = run(False)
    else:
        out = run(False)

    return out[:batch, :output_dim]


# ---------------------------------------------------------------------------
# Parameter construction (deterministic, mimics module __init__ shapes)
# ---------------------------------------------------------------------------
def init_params(key, input_dim, latent_dim, output_dim, n_layers):
    params = []
    dims_in = [input_dim] + [latent_dim] * (n_layers - 1)
    for d_in in dims_in:
        key, k_w, k_b, k_g, k_be, k_m, k_v = jax.random.split(key, 7)
        bound = 1.0 / jnp.sqrt(d_in)
        w = jax.random.uniform(k_w, (latent_dim, d_in), jnp.float32, -bound, bound)
        b = jax.random.uniform(k_b, (latent_dim,), jnp.float32, -bound, bound)
        gamma = jax.random.uniform(k_g, (latent_dim,), jnp.float32, 0.5, 1.5)
        beta = jax.random.uniform(k_be, (latent_dim,), jnp.float32, -0.5, 0.5)
        run_mean = jax.random.uniform(k_m, (latent_dim,), jnp.float32, -0.5, 0.5)
        run_var = jax.random.uniform(k_v, (latent_dim,), jnp.float32, 0.5, 1.5)
        params.append(dict(w=w, b=b, gamma=gamma, beta=beta,
                           mean=run_mean, var=run_var))
    key, k_w, k_b = jax.random.split(key, 3)
    bound = 1.0 / jnp.sqrt(latent_dim)
    w_out = jax.random.uniform(k_w, (output_dim, latent_dim), jnp.float32, -bound, bound)
    b_out = jax.random.uniform(k_b, (output_dim,), jnp.float32, -bound, bound)
    return params, (w_out, b_out)


def mlp_classifier_reference(x, hidden_params, head_params, eps=1e-5):
    """Pure-JAX f32 reference matching PyTorch eval-mode semantics."""
    h = x
    for p in hidden_params:
        h = jnp.maximum(h @ p["w"].T + p["b"], 0.0)
        h = (h - p["mean"]) / jnp.sqrt(p["var"] + eps) * p["gamma"] + p["beta"]
    w_out, b_out = head_params
    return h @ w_out.T + b_out


# ---------------------------------------------------------------------------
if __name__ == "__main__":
    batch, input_dim, latent_dim, output_dim, n_layers = 8, 16, 32, 10, 2
    dropout_rate = 0.5  # identity in eval mode

    key = jax.random.PRNGKey(0)
    key, k_x = jax.random.split(key)
    x = jax.random.normal(k_x, (batch, input_dim), jnp.float32)

    hidden_params, head_params = init_params(
        key, input_dim, latent_dim, output_dim, n_layers)

    # One-time prep (transpose + BN-into-next-layer fold + padding + bf16 cast).
    prepared_hidden, prepared_head, out_dim = prepare_params(
        hidden_params, head_params)

    logits = mlp_classifier_forward(x, prepared_hidden, prepared_head, out_dim)
    logits = jax.block_until_ready(logits)

    ref = mlp_classifier_reference(x, hidden_params, head_params)
    assert logits.shape == (batch, output_dim)
    # bf16 MXU operands with f32 accumulation vs an f32 reference.
    assert jnp.allclose(logits, ref, atol=5e-2, rtol=5e-2), "mismatch vs reference"

    # Exercise the multi-tile (>= 2 grid steps / v7x two-TensorCore) path too.
    key, k_x2 = jax.random.split(key)
    x2 = jax.random.normal(k_x2, (40, input_dim), jnp.float32)
    logits2 = jax.block_until_ready(
        mlp_classifier_forward(x2, prepared_hidden, prepared_head, out_dim))
    ref2 = mlp_classifier_reference(x2, hidden_params, head_params)
    assert logits2.shape == (40, output_dim)
    assert jnp.allclose(logits2, ref2, atol=5e-2, rtol=5e-2), "mismatch vs reference (multi-tile)"

    print("KERNEL_OK")
</pallas_src>

<mosaic_0001>
module attributes {stable_mosaic.version = 11 : i64} {
  func.func @kernel(%arg0: i32, %arg1: memref<16x128xbf16, #tpu.memory_space<vmem>>, %arg2: memref<128x128xbf16, #tpu.memory_space<vmem>>, %arg3: memref<8x128xf32, #tpu.memory_space<vmem>>, %arg4: memref<128x128xbf16, #tpu.memory_space<vmem>>, %arg5: memref<8x128xf32, #tpu.memory_space<vmem>>, %arg6: memref<128x128xbf16, #tpu.memory_space<vmem>>, %arg7: memref<8x128xf32, #tpu.memory_space<vmem>>, %arg8: memref<16x128xf32, #tpu.memory_space<vmem>>) attributes {dimension_semantics = [#tpu.dimension_semantics<parallel>], iteration_bounds = array<i64: 1>, scalar_prefetch = 0 : i64, scratch_operands = 0 : i64, tpu.core_type = #tpu.core_type<tc>, window_params = [{transform_indices = @transform_0, window_bounds = array<i64: 16, 128>}, {pipeline_mode = #tpu.pipeline_mode<synchronous>, transform_indices = @transform_1, window_bounds = array<i64: 128, 128>}, {pipeline_mode = #tpu.pipeline_mode<synchronous>, transform_indices = @transform_2, window_bounds = array<i64: 8, 128>}, {pipeline_mode = #tpu.pipeline_mode<synchronous>, transform_indices = @transform_3, window_bounds = array<i64: 128, 128>}, {pipeline_mode = #tpu.pipeline_mode<synchronous>, transform_indices = @transform_4, window_bounds = array<i64: 8, 128>}, {pipeline_mode = #tpu.pipeline_mode<synchronous>, transform_indices = @transform_5, window_bounds = array<i64: 128, 128>}, {pipeline_mode = #tpu.pipeline_mode<synchronous>, transform_indices = @transform_6, window_bounds = array<i64: 8, 128>}, {transform_indices = @transform_7, window_bounds = array<i64: 16, 128>}]} {
    %c0 = arith.constant 0 : index
    %c0_0 = arith.constant 0 : index
    %0 = vector.load %arg1[%c0, %c0_0] : memref<16x128xbf16, #tpu.memory_space<vmem>>, vector<16x128xbf16>
    %c0_1 = arith.constant 0 : index
    %c0_2 = arith.constant 0 : index
    %1 = vector.load %arg2[%c0_1, %c0_2] : memref<128x128xbf16, #tpu.memory_space<vmem>>, vector<128x128xbf16>
    %cst = arith.constant dense<0.000000e+00> : vector<16x128xf32>
    %2 = tpu.matmul %0, %1, %cst {dimension_numbers = #tpu.dot_dimension_numbers<[1], [0], [0], [1], [0, 0, 1, 1], [], []>} : vector<16x128xbf16>, vector<128x128xbf16>, vector<16x128xf32> -> vector<16x128xf32>
    %c0_3 = arith.constant 0 : index
    %c0_4 = arith.constant 0 : index
    %3 = vector.load %arg3[%c0_3, %c0_4] : memref<8x128xf32, #tpu.memory_space<vmem>>, vector<1x128xf32>
    %4 = vector.broadcast %3 : vector<1x128xf32> to vector<16x128xf32>
    %5 = arith.addf %2, %4 : vector<16x128xf32>
    %cst_5 = arith.constant 0.000000e+00 : f32
    %6 = vector.broadcast %cst_5 : f32 to vector<16x128xf32>
    %7 = arith.maximumf %5, %6 : vector<16x128xf32>
    %8 = arith.truncf %7 : vector<16x128xf32> to vector<16x128xbf16>
    %c0_6 = arith.constant 0 : index
    %c0_7 = arith.constant 0 : index
    %9 = vector.load %arg4[%c0_6, %c0_7] : memref<128x128xbf16, #tpu.memory_space<vmem>>, vector<128x128xbf16>
    %cst_8 = arith.constant dense<0.000000e+00> : vector<16x128xf32>
    %10 = tpu.matmul %8, %9, %cst_8 {dimension_numbers = #tpu.dot_dimension_numbers<[1], [0], [0], [1], [0, 0, 1, 1], [], []>} : vector<16x128xbf16>, vector<128x128xbf16>, vector<16x128xf32> -> vector<16x128xf32>
    %c0_9 = arith.constant 0 : index
    %c0_10 = arith.constant 0 : index
    %11 = vector.load %arg5[%c0_9, %c0_10] : memref<8x128xf32, #tpu.memory_space<vmem>>, vector<1x128xf32>
    %12 = vector.broadcast %11 : vector<1x128xf32> to vector<16x128xf32>
    %13 = arith.addf %10, %12 : vector<16x128xf32>
    %cst_11 = arith.constant 0.000000e+00 : f32
    %14 = vector.broadcast %cst_11 : f32 to vector<16x128xf32>
    %15 = arith.maximumf %13, %14 : vector<16x128xf32>
    %16 = arith.truncf %15 : vector<16x128xf32> to vector<16x128xbf16>
    %c0_12 = arith.constant 0 : index
    %c0_13 = arith.constant 0 : index
    %17 = vector.load %arg6[%c0_12, %c0_13] : memref<128x128xbf16, #tpu.memory_space<vmem>>, vector<128x128xbf16>
    %cst_14 = arith.constant dense<0.000000e+00> : vector<16x128xf32>
    %18 = tpu.matmul %16, %17, %cst_14 {dimension_numbers = #tpu.dot_dimension_numbers<[1], [0], [0], [1], [0, 0, 1, 1], [], []>} : vector<16x128xbf16>, vector<128x128xbf16>, vector<16x128xf32> -> vector<16x128xf32>
    %c0_15 = arith.constant 0 : index
    %c0_16 = arith.constant 0 : index
    %19 = vector.load %arg7[%c0_15, %c0_16] : memref<8x128xf32, #tpu.memory_space<vmem>>, vector<1x128xf32>
    %20 = vector.broadcast %19 : vector<1x128xf32> to vector<16x128xf32>
    %21 = arith.addf %18, %20 : vector<16x128xf32>
    %c0_17 = arith.constant 0 : index
    %c0_18 = arith.constant 0 : index
    %22 = vector.load %arg8[%c0_17, %c0_18] : memref<16x128xf32, #tpu.memory_space<vmem>>, vector<16x128xf32>
    tpu.vector_store %arg8[%c0_17, %c0_18], %21 {strides = array<i32>} : memref<16x128xf32, #tpu.memory_space<vmem>>, vector<16x128xf32>,
    return
  }
  func.func @transform_0(%arg0: i32) -> (i32, i32) {
    %c0_i32 = arith.constant 0 : i32
    %c0_i32_0 = arith.constant 0 : i32
    return %arg0, %c0_i32 : i32, i32
  }
  func.func @transform_1(%arg0: i32) -> (i32, i32) {
    %c0_i32 = arith.constant 0 : i32
    %c0_i32_0 = arith.constant 0 : i32
    %c0_i32_1 = arith.constant 0 : i32
    return %c0_i32, %c0_i32_0 : i32, i32
  }
  func.func @transform_2(%arg0: i32) -> (i32, i32) {
    %c0_i32 = arith.constant 0 : i32
    %c0_i32_0 = arith.constant 0 : i32
    %c0_i32_1 = arith.constant 0 : i32
    return %c0_i32, %c0_i32_0 : i32, i32
  }
  func.func @transform_3(%arg0: i32) -> (i32, i32) {
    %c0_i32 = arith.constant 0 : i32
    %c0_i32_0 = arith.constant 0 : i32
    %c0_i32_1 = arith.constant 0 : i32
    return %c0_i32, %c0_i32_0 : i32, i32
  }
  func.func @transform_4(%arg0: i32) -> (i32, i32) {
    %c0_i32 = arith.constant 0 : i32
    %c0_i32_0 = arith.constant 0 : i32
    %c0_i32_1 = arith.constant 0 : i32
    return %c0_i32, %c0_i32_0 : i32, i32
  }
  func.func @transform_5(%arg0: i32) -> (i32, i32) {
    %c0_i32 = arith.constant 0 : i32
    %c0_i32_0 = arith.constant 0 : i32
    %c0_i32_1 = arith.constant 0 : i32
    return %c0_i32, %c0_i32_0 : i32, i32
  }
  func.func @transform_6(%arg0: i32) -> (i32, i32) {
    %c0_i32 = arith.constant 0 : i32
    %c0_i32_0 = arith.constant 0 : i32
    %c0_i32_1 = arith.constant 0 : i32
    return %c0_i32, %c0_i32_0 : i32, i32
  }
  func.func @transform_7(%arg0: i32) -> (i32, i32) {
    %c0_i32 = arith.constant 0 : i32
    %c0_i32_0 = arith.constant 0 : i32
    return %arg0, %c0_i32 : i32, i32
  }
}

module attributes {stable_mosaic.version = 11 : i64} {
  func.func @kernel(%arg0: i32, %arg1: memref<16x128xbf16, #tpu.memory_space<vmem>>, %arg2: memref<128x128xbf16, #tpu.memory_space<vmem>>, %arg3: memref<8x128xf32, #tpu.memory_space<vmem>>, %arg4: memref<128x128xbf16, #tpu.memory_space<vmem>>, %arg5: memref<8x128xf32, #tpu.memory_space<vmem>>, %arg6: memref<128x128xbf16, #tpu.memory_space<vmem>>, %arg7: memref<8x128xf32, #tpu.memory_space<vmem>>, %arg8: memref<16x128xf32, #tpu.memory_space<vmem>>) attributes {dimension_semantics = [#tpu.dimension_semantics<parallel>], iteration_bounds = array<i64: 1>, scalar_prefetch = 0 : i64, scratch_operands = 0 : i64, tpu.core_type = #tpu.core_type<tc>, window_params = [{transform_indices = @transform_0, window_bounds = array<i64: 16, 128>}, {pipeline_mode = #tpu.pipeline_mode<synchronous>, transform_indices = @transform_1, window_bounds = array<i64: 128, 128>}, {pipeline_mode = #tpu.pipeline_mode<synchronous>, transform_indices = @transform_2, window_bounds = array<i64: 8, 128>}, {pipeline_mode = #tpu.pipeline_mode<synchronous>, transform_indices = @transform_3, window_bounds = array<i64: 128, 128>}, {pipeline_mode = #tpu.pipeline_mode<synchronous>, transform_indices = @transform_4, window_bounds = array<i64: 8, 128>}, {pipeline_mode = #tpu.pipeline_mode<synchronous>, transform_indices = @transform_5, window_bounds = array<i64: 128, 128>}, {pipeline_mode = #tpu.pipeline_mode<synchronous>, transform_indices = @transform_6, window_bounds = array<i64: 8, 128>}, {transform_indices = @transform_7, window_bounds = array<i64: 16, 128>}]} {
    %c0 = arith.constant 0 : index
    %c0_0 = arith.constant 0 : index
    %0 = vector.load %arg1[%c0, %c0_0] : memref<16x128xbf16, #tpu.memory_space<vmem>>, vector<16x128xbf16>
    %c0_1 = arith.constant 0 : index
    %c0_2 = arith.constant 0 : index
    %1 = vector.load %arg2[%c0_1, %c0_2] : memref<128x128xbf16, #tpu.memory_space<vmem>>, vector<128x128xbf16>
    %cst = arith.constant dense<0.000000e+00> : vector<16x128xf32>
    %2 = tpu.matmul %0, %1, %cst {dimension_numbers = #tpu.dot_dimension_numbers<[1], [0], [0], [1], [0, 0, 1, 1], [], []>} : vector<16x128xbf16>, vector<128x128xbf16>, vector<16x128xf32> -> vector<16x128xf32>
    %c0_3 = arith.constant 0 : index
    %c0_4 = arith.constant 0 : index
    %3 = vector.load %arg3[%c0_3, %c0_4] : memref<8x128xf32, #tpu.memory_space<vmem>>, vector<1x128xf32>
    %4 = vector.broadcast %3 : vector<1x128xf32> to vector<16x128xf32>
    %5 = arith.addf %2, %4 : vector<16x128xf32>
    %cst_5 = arith.constant 0.000000e+00 : f32
    %6 = vector.broadcast %cst_5 : f32 to vector<16x128xf32>
    %7 = arith.maximumf %5, %6 : vector<16x128xf32>
    %8 = arith.truncf %7 : vector<16x128xf32> to vector<16x128xbf16>
    %c0_6 = arith.constant 0 : index
    %c0_7 = arith.constant 0 : index
    %9 = vector.load %arg4[%c0_6, %c0_7] : memref<128x128xbf16, #tpu.memory_space<vmem>>, vector<128x128xbf16>
    %cst_8 = arith.constant dense<0.000000e+00> : vector<16x128xf32>
    %10 = tpu.matmul %8, %9, %cst_8 {dimension_numbers = #tpu.dot_dimension_numbers<[1], [0], [0], [1], [0, 0, 1, 1], [], []>} : vector<16x128xbf16>, vector<128x128xbf16>, vector<16x128xf32> -> vector<16x128xf32>
    %c0_9 = arith.constant 0 : index
    %c0_10 = arith.constant 0 : index
    %11 = vector.load %arg5[%c0_9, %c0_10] : memref<8x128xf32, #tpu.memory_space<vmem>>, vector<1x128xf32>
    %12 = vector.broadcast %11 : vector<1x128xf32> to vector<16x128xf32>
    %13 = arith.addf %10, %12 : vector<16x128xf32>
    %cst_11 = arith.constant 0.000000e+00 : f32
    %14 = vector.broadcast %cst_11 : f32 to vector<16x128xf32>
    %15 = arith.maximumf %13, %14 : vector<16x128xf32>
    %16 = arith.truncf %15 : vector<16x128xf32> to vector<16x128xbf16>
    %c0_12 = arith.constant 0 : index
    %c0_13 = arith.constant 0 : index
    %17 = vector.load %arg6[%c0_12, %c0_13] : memref<128x128xbf16, #tpu.memory_space<vmem>>, vector<128x128xbf16>
    %cst_14 = arith.constant dense<0.000000e+00> : vector<16x128xf32>
    %18 = tpu.matmul %16, %17, %cst_14 {dimension_numbers = #tpu.dot_dimension_numbers<[1], [0], [0], [1], [0, 0, 1, 1], [], []>} : vector<16x128xbf16>, vector<128x128xbf16>, vector<16x128xf32> -> vector<16x128xf32>
    %c0_15 = arith.constant 0 : index
    %c0_16 = arith.constant 0 : index
    %19 = vector.load %arg7[%c0_15, %c0_16] : memref<8x128xf32, #tpu.memory_space<vmem>>, vector<1x128xf32>
    %20 = vector.broadcast %19 : vector<1x128xf32> to vector<16x128xf32>
    %21 = arith.addf %18, %20 : vector<16x128xf32>
    %c0_17 = arith.constant 0 : index
    %c0_18 = arith.constant 0 : index
    %22 = vector.load %arg8[%c0_17, %c0_18] : memref<16x128xf32, #tpu.memory_space<vmem>>, vector<16x128xf32>
    tpu.vector_store %arg8[%c0_17, %c0_18], %21 {strides = array<i32>} : memref<16x128xf32, #tpu.memory_space<vmem>>, vector<16x128xf32>,
    return
  }
  func.func @transform_0(%arg0: i32) -> (i32, i32) {
    %c0_i32 = arith.constant 0 : i32
    %c0_i32_0 = arith.constant 0 : i32
    return %arg0, %c0_i32 : i32, i32
  }
  func.func @transform_1(%arg0: i32) -> (i32, i32) {
    %c0_i32 = arith.constant 0 : i32
    %c0_i32_0 = arith.constant 0 : i32
    %c0_i32_1 = arith.constant 0 : i32
    return %c0_i32, %c0_i32_0 : i32, i32
  }
  func.func @transform_2(%arg0: i32) -> (i32, i32) {
    %c0_i32 = arith.constant 0 : i32
    %c0_i32_0 = arith.constant 0 : i32
    %c0_i32_1 = arith.constant 0 : i32
    return %c0_i32, %c0_i32_0 : i32, i32
  }
  func.func @transform_3(%arg0: i32) -> (i32, i32) {
    %c0_i32 = arith.constant 0 : i32
    %c0_i32_0 = arith.constant 0 : i32
    %c0_i32_1 = arith.constant 0 : i32
    return %c0_i32, %c0_i32_0 : i32, i32
  }
  func.func @transform_4(%arg0: i32) -> (i32, i32) {
    %c0_i32 = arith.constant 0 : i32
    %c0_i32_0 = arith.constant 0 : i32
    %c0_i32_1 = arith.constant 0 : i32
    return %c0_i32, %c0_i32_0 : i32, i32
  }
  func.func @transform_5(%arg0: i32) -> (i32, i32) {
    %c0_i32 = arith.constant 0 : i32
    %c0_i32_0 = arith.constant 0 : i32
    %c0_i32_1 = arith.constant 0 : i32
    return %c0_i32, %c0_i32_0 : i32, i32
  }
  func.func @transform_6(%arg0: i32) -> (i32, i32) {
    %c0_i32 = arith.constant 0 : i32
    %c0_i32_0 = arith.constant 0 : i32
    %c0_i32_1 = arith.constant 0 : i32
    return %c0_i32, %c0_i32_0 : i32, i32
  }
  func.func @transform_7(%arg0: i32) -> (i32, i32) {
    %c0_i32 = arith.constant 0 : i32
    %c0_i32_0 = arith.constant 0 : i32
    return %arg0, %c0_i32 : i32, i32
  }
}

</mosaic_0001>

<bundles_post_ra>
// kernel: tpu_custom_call.1
= control target key start
LH: loop header
LB: loop body
LE: loop exit
PB: predicated region body
PF: predicated region fallthrough
CT: control target
= control target key end

     0   :  { %12 = vsyncpa [#allocation3], 0  ;;  %s930_s0 = inlined_call_operand.hbm [shape: bf16[16,128], index: 0, kind: input, shape index: {}]   ;;  %s931_s1 = inlined_call_operand.hbm [shape: bf16[128,128], index: 1, kind: input, shape index: {}]   ;;  %s932_s2 = inlined_call_operand.hbm [shape: f32[8,128], index: 2, kind: input, shape index: {}]   ;;  %s933_s3 = inlined_call_operand.hbm [shape: bf16[128,128], index: 3, kind: input, shape index: {}]   ;;  %s934_s4 = inlined_call_operand.vmem [shape: f32[8,128], index: 4, kind: input, shape index: {}]   ;;  %s935_s5 = inlined_call_operand.hbm [shape: bf16[128,128], index: 5, kind: input, shape index: {}]   ;;  %s936_s6 = inlined_call_operand.vmem [shape: f32[8,128], index: 6, kind: input, shape index: {}]   ;;  %s937_s7 = inlined_call_operand.hbm [shape: f32[16,128], index: 7, kind: output, shape index: {}]  }
   0x1   :  { %13 = vsyncpa [#allocation6], 0 }
   0x2   :  { %14 = vsyncpa [#allocation9], 0 }
   0x3   :  { %15 = vsyncpa [#allocation4], 0  ;;  %s751_s24 = smov [#allocation5]   ;;  %s752_s26 = smov [#allocation8]  }
   0x4   :  { %s33_s25 = sshll.u32 %s751_s24, 4  ;;  %s55_s27 = sshll.u32 %s752_s26, 4  ;;  %s34_s25 = int_to_ptr.vmem [resolvable:$true] %s33_s25  ;;  %s803_s27 = int_to_ptr.vmem [resolvable:$true] %s55_s27 }
   0x5   :  { %s611_s30 = scalar_lea.hbm %s931_s1, 1024 }
   0x6   :  { %p612_p0 = scmp.ne.s32.totalorder %s931_s1, %s611_s30  ;;  %p615_p1 = scmp.lt.u32.totalorder %s611_s30, %s931_s1 }
   0x8   :  { %p617_p2 = pnand %p615_p1, %p612_p0 }
   0xa   :  { %620 = shalt.err (!%p617_p2)
}
   0xb   :  { %s621_s12 = scalar_lea.vmem %s34_s25, 1024  ;;  %p626_p4 = scmp.lt.s32.totalorder %s34_s25, %s34_s25 }
   0xc   :  { %p622_p3 = scmp.ne.s32.totalorder %s34_s25, %s621_s12  ;;  %p627_p5 = scmp.lt.s32.totalorder %s621_s12, %s621_s12 }
   0xe   :  { %p628_p6 = por %p627_p5, %p626_p4 }
  0x10   :  { %p629_p7 = pnand %p628_p6, %p622_p3 }
  0x12   :  { %632 = shalt.err (!%p629_p7)
}
  0x13   :  { %s753_s13 = smov 64   ;;  %s754_s14 = smov 4  }
  0x14   :  { %39 = dma.hbm_to_vmem [thread:$0]  %s931_s1, 1024, %s34_s25, [#allocation6], %s753_s13, %s753_s13, %s754_s14  }
  0x15   :  { %s633_s19 = scalar_lea.hbm %s933_s3, 1024 }
  0x16   :  { %p634_p8 = scmp.ne.s32.totalorder %s933_s3, %s633_s19  ;;  %p637_p9 = scmp.lt.u32.totalorder %s633_s19, %s933_s3 }
  0x18   :  { %p639_p10 = pnand %p637_p9, %p634_p8 }
  0x1a   :  { %642 = shalt.err (!%p639_p10)
}
  0x1b   :  { %s643_s24 = scalar_lea.vmem %s803_s27, 1024  ;;  %p648_p12 = scmp.lt.s32.totalorder %s803_s27, %s803_s27 }
  0x1c   :  { %p644_p11 = scmp.ne.s32.totalorder %s803_s27, %s643_s24  ;;  %p649_p13 = scmp.lt.s32.totalorder %s643_s24, %s643_s24 }
  0x1e   :  { %p650_p0 = por %p649_p13, %p648_p12 }
  0x20   :  { %p651_p1 = pnand %p650_p0, %p644_p11 }
  0x22   :  { %654 = shalt.err (!%p651_p1)
}
  0x23   :  { %61 = dma.hbm_to_vmem [thread:$0]  %s933_s3, 1024, %s803_s27, [#allocation9], %s753_s13, %s753_s13, %s754_s14  }
  0x24   :  { %s755_s26 = smov [#allocation2]   ;;  %s756_s29 = smov [#allocation7]  }
  0x25   :  { %s21_s28 = sshll.u32 %s755_s26, 4  ;;  %s46_s30 = sshll.u32 %s756_s29, 4  ;;  %s22_s28 = int_to_ptr.vmem [resolvable:$true] %s21_s28  ;;  %s47_s30 = int_to_ptr.vmem [resolvable:$true] %s46_s30 }
  0x26   :  { %s655_s10 = scalar_lea.hbm %s930_s0, 128 }
  0x27   :  { %p656_p2 = scmp.ne.s32.totalorder %s930_s0, %s655_s10  ;;  %p659_p3 = scmp.lt.u32.totalorder %s655_s10, %s930_s0 }
  0x29   :  { %p661_p4 = pnand %p659_p3, %p656_p2 }
  0x2b   :  { %664 = shalt.err (!%p661_p4)
}
  0x2c   :  { %s665_s3 = scalar_lea.vmem %s22_s28, 128  ;;  %p670_p6 = scmp.lt.s32.totalorder %s22_s28, %s22_s28 }
  0x2d   :  { %p666_p5 = scmp.ne.s32.totalorder %s22_s28, %s665_s3  ;;  %p671_p7 = scmp.lt.s32.totalorder %s665_s3, %s665_s3 }
  0x2f   :  { %p672_p8 = por %p671_p7, %p670_p6 }
  0x31   :  { %p673_p9 = pnand %p672_p8, %p666_p5 }
  0x33   :  { %676 = shalt.err (!%p673_p9)
}
  0x34   :  { %27 = dma.hbm_to_vmem [thread:$0]  %s930_s0, 128, %s22_s28, [#allocation3], %s753_s13, %s753_s13, %s754_s14  }
  0x35   :  { %s677_s20 = scalar_lea.hbm %s932_s2, 128 }
  0x36   :  { %p678_p10 = scmp.ne.s32.totalorder %s932_s2, %s677_s20  ;;  %p681_p11 = scmp.lt.u32.totalorder %s677_s20, %s932_s2 }
  0x38   :  { %p683_p12 = pnand %p681_p11, %p678_p10 }
  0x3a   :  { %686 = shalt.err (!%p683_p12)
}
  0x3b   :  { %s687_s1 = scalar_lea.vmem %s47_s30, 128  ;;  %p692_p0 = scmp.lt.s32.totalorder %s47_s30, %s47_s30 }
  0x3c   :  { %p688_p13 = scmp.ne.s32.totalorder %s47_s30, %s687_s1  ;;  %p693_p1 = scmp.lt.s32.totalorder %s687_s1, %s687_s1 }
  0x3e   :  { %p694_p2 = por %p693_p1, %p692_p0 }
  0x40   :  { %p695_p3 = pnand %p694_p2, %p688_p13 }
  0x42   :  { %698 = shalt.err (!%p695_p3)
}
  0x43   :  { %49 = dma.hbm_to_vmem [thread:$0]  %s932_s2, 128, %s47_s30, [#allocation6]  }
  0x44   :  { %s757_s26 = smov [#allocation10]   ;;  %s699_s9 = scalar_lea.hbm %s935_s5, 1024 }
  0x45   :  { %s69_s28 = sshll.u32 %s757_s26, 4  ;;  %p700_p4 = scmp.ne.s32.totalorder %s935_s5, %s699_s9  ;;  %s70_s28 = int_to_ptr.vmem [resolvable:$true] %s69_s28 }
  0x46   :  { %p703_p5 = scmp.lt.u32.totalorder %s699_s9, %s935_s5 }
  0x48   :  { %p705_p6 = pnand %p703_p5, %p700_p4 }
  0x4a   :  { %708 = shalt.err (!%p705_p6)
}
  0x4b   :  { %s709_s16 = scalar_lea.vmem %s70_s28, 1024  ;;  %p714_p8 = scmp.lt.s32.totalorder %s70_s28, %s70_s28 }
  0x4c   :  { %p710_p7 = scmp.ne.s32.totalorder %s70_s28, %s709_s16  ;;  %p715_p9 = scmp.lt.s32.totalorder %s709_s16, %s709_s16 }
  0x4e   :  { %p716_p10 = por %p715_p9, %p714_p8 }
  0x50   :  { %p717_p11 = pnand %p716_p10, %p710_p7 }
  0x52   :  { %720 = shalt.err (!%p717_p11)
}
  0x53   :  { %75 = dma.hbm_to_vmem [thread:$0]  %s935_s5, 1024, %s70_s28, [#allocation9], %s753_s13, %s753_s13, %s754_s14  }
  0x54   :  { %743 = dma.done.wait [#allocation3], 128  }
  0x55   :  { %744 = vsyncadd [#allocation3], 4294967168 }
  0x56   :  { %745 = dma.done.wait [#allocation6], 1152  }
  0x57   :  { %746 = vsyncadd [#allocation6], 4294966144 }
  0x58   :  { %747 = dma.done.wait [#allocation9], 2048  }
  0x59   :  { %748 = vsyncadd [#allocation9], 4294965248  ;;  %v758_v0 = vmov 0.0   ;;  %vm759_vm0 = vmmov 0   ;;  %v586_v1 = vld [vmem:[#allocation5] sm:$0xff]   ;;  %v587_v2 = vld [vmem:[#allocation5 + $0x8] sm:$0xff]  }
  0x5a   :  { %514 = vmatprep.subr.bf16.mxu0 %v758_v0  ;;  %530 = vmatprep.mubr.msk.bf16.mxu0 %vm759_vm0, %v758_v0  ;;  %v588_v3 = vld [vmem:[#allocation5 + $0x10] sm:$0xff]   ;;  %v595_v4 = vld [vmem:[#allocation8] sm:$0xff]   ;;  %v589_v5 = vld [vmem:[#allocation5 + $0x18] sm:$0xff]   ;;  %s760_s27 = smov [#allocation11]  }
  0x5b   :  { %534 = vmatprep.subr.bf16.mxu1 %v758_v0  ;;  %550 = vmatprep.mubr.msk.bf16.mxu1 %vm759_vm0, %v758_v0  ;;  %v596_v6 = vld [vmem:[#allocation8 + $0x8] sm:$0xff]   ;;  %v590_v7 = vld [vmem:[#allocation5 + $0x20] sm:$0xff]   ;;  %v597_v8 = vld [vmem:[#allocation8 + $0x10] sm:$0xff]   ;;  %s445_s17 = sshll.u32 %s760_s27, 4  ;;  %s446_s17 = int_to_ptr.vmem [resolvable:$true] %s445_s17 }
  0x5c   :  { %515 = vmatpush3.bf16.msra.mxu0 %v586_v1  ;;  %535 = vmatpush3.bf16.msra.mxu1 %v595_v4  ;;  %v591_v9 = vld [vmem:[#allocation5 + $0x28] sm:$0xff]   ;;  %v598_v10 = vld [vmem:[#allocation8 + $0x18] sm:$0xff]   ;;  %v592_v11 = vld [vmem:[#allocation5 + $0x30] sm:$0xff]   ;;  %p726_p13 = scmp.lt.s32.totalorder %s446_s17, %s446_s17 }
  0x5d   :  { %516 = vmatprep.subr.bf16.mxu0 %v758_v0  ;;  %536 = vmatprep.subr.bf16.mxu1 %v758_v0  ;;  %v599_v12 = vld [vmem:[#allocation8 + $0x20] sm:$0xff]   ;;  %v593_v13 = vld [vmem:[#allocation5 + $0x38] sm:$0xff]   ;;  %v600_v14 = vld [vmem:[#allocation8 + $0x28] sm:$0xff]  }
  0x5e   :  { %v594_v15 = vld [vmem:[#allocation2] sm:$0xff]   ;;  %v602_v17 = vld [vmem:[#allocation8 + $0x38] sm:$0xff]   ;;  %v603_v18 = vld [vmem:[#allocation10] sm:$0xff]  }
  0x5f   :  { %v601_v16 = vld [vmem:[#allocation8 + $0x30] sm:$0xff]   ;;  %v604_v19 = vld [vmem:[#allocation10 + $0x8] sm:$0xff]   ;;  %v606_v21 = vld [vmem:[#allocation10 + $0x18] sm:$0xff]  }
  0x60   :  { %517 = vmatpush3.bf16.msra.mxu0 %v587_v2  ;;  %537 = vmatpush3.bf16.msra.mxu1 %v596_v6  ;;  %v605_v20 = vld [vmem:[#allocation10 + $0x10] sm:$0xff]   ;;  %v607_v22 = vld [vmem:[#allocation10 + $0x20] sm:$0xff]   ;;  %v608_v23 = vld [vmem:[#allocation10 + $0x28] sm:$0xff]  }
  0x61   :  { %518 = vmatprep.subr.bf16.mxu0 %v758_v0  ;;  %538 = vmatprep.subr.bf16.mxu1 %v758_v0  ;;  %v459_v24 = vld [vmem:[#allocation7] ss:$0 sm:$0xff]  ;;  %v609_v34 = vld [vmem:[#allocation10 + $0x30] sm:$0xff]  }
  0x62   :  { %v610_v35 = vld [vmem:[#allocation10 + $0x38] sm:$0xff]   ;;  %v469_v36 = vld [vmem:[%s934_s4] ss:$0 sm:$0xff]  ;;  %s721_s4 = scalar_lea.vmem %s446_s17, 256 }
  0x63   :  { %v478_v46 = vld [vmem:[%s936_s6] ss:$0 sm:$0xff]  ;;  %p722_p12 = scmp.ne.s32.totalorder %s446_s17, %s721_s4  ;;  %p727_p0 = scmp.lt.s32.totalorder %s721_s4, %s721_s4 }
  0x64   :  { %519 = vmatpush3.bf16.msra.mxu0 %v588_v3  ;;  %539 = vmatpush3.bf16.msra.mxu1 %v597_v8 }
  0x65   :  { %520 = vmatprep.subr.bf16.mxu0 %v758_v0  ;;  %540 = vmatprep.subr.bf16.mxu1 %v758_v0  ;;  %p728_p1 = por %p727_p0, %p726_p13 }
  0x67   :  { %p729_p2 = pnand %p728_p1, %p722_p12 }
  0x68   :  { %521 = vmatpush3.bf16.msra.mxu0 %v589_v5  ;;  %541 = vmatpush3.bf16.msra.mxu1 %v598_v10 }
  0x69   :  { %522 = vmatprep.subr.bf16.mxu0 %v758_v0  ;;  %542 = vmatprep.subr.bf16.mxu1 %v758_v0 }
  0x6c   :  { %523 = vmatpush3.bf16.msra.mxu0 %v590_v7  ;;  %543 = vmatpush3.bf16.msra.mxu1 %v599_v12 }
  0x6d   :  { %524 = vmatprep.subr.bf16.mxu0 %v758_v0  ;;  %544 = vmatprep.subr.bf16.mxu1 %v758_v0 }
  0x70   :  { %525 = vmatpush3.bf16.msra.mxu0 %v591_v9  ;;  %545 = vmatpush3.bf16.msra.mxu1 %v600_v14 }
  0x71   :  { %526 = vmatprep.subr.bf16.mxu0 %v758_v0  ;;  %546 = vmatprep.subr.bf16.mxu1 %v758_v0 }
  0x74   :  { %527 = vmatpush3.bf16.msra.mxu0 %v592_v11  ;;  %547 = vmatpush3.bf16.msra.mxu1 %v601_v16 }
  0x75   :  { %528 = vmatprep.subr.bf16.mxu0 %v758_v0  ;;  %548 = vmatprep.subr.bf16.mxu1 %v758_v0 }
  0x78   :  { %529 = vmatpush3.bf16.msra.mxu0 %v593_v13  ;;  %549 = vmatpush3.bf16.msra.mxu1 %v602_v17 }
  0x79   :  { %554 = vmatprep.subr.bf16.mxu0 %v758_v0 }
  0x7b   :  { %531 = vmatmul.mubr.bf16.vlgmr.msra.gmra.mrb[0].mxu0 %v594_v15 }
  0x7c   :  { %570 = vmatprep.mubr.msk.bf16.mxu0 %vm759_vm0, %v758_v0  ;;  %555 = vmatpush3.bf16.msra.mxu0 %v603_v18 }
  0x7d   :  { %556 = vmatprep.subr.bf16.mxu0 %v758_v0 }
  0x80   :  { %557 = vmatpush3.bf16.msra.mxu0 %v604_v19 }
  0x81   :  { %558 = vmatprep.subr.bf16.mxu0 %v758_v0 }
  0x84   :  { %559 = vmatpush3.bf16.msra.mxu0 %v605_v20 }
  0x85   :  { %560 = vmatprep.subr.bf16.mxu0 %v758_v0 }
  0x88   :  { %561 = vmatpush3.bf16.msra.mxu0 %v606_v21 }
  0x89   :  { %562 = vmatprep.subr.bf16.mxu0 %v758_v0 }
  0x8c   :  { %563 = vmatpush3.bf16.msra.mxu0 %v607_v22 }
  0x8d   :  { %564 = vmatprep.subr.bf16.mxu0 %v758_v0 }
  0x90   :  { %565 = vmatpush3.bf16.msra.mxu0 %v608_v23 }
  0x91   :  { %566 = vmatprep.subr.bf16.mxu0 %v758_v0 }
  0x94   :  { %567 = vmatpush3.bf16.msra.mxu0 %v609_v34 }
  0x95   :  { %568 = vmatprep.subr.bf16.mxu0 %v758_v0 }
  0x98   :  { %569 = vmatpush3.bf16.msra.mxu0 %v610_v35 }
 0x14e   :  { %v205_v25 = vpop.f32.mrb[0].mxu0 }
 0x14f   :  { %v206_v26 = vadd.f32 %v459_v24, %v205_v25  ;;  %v532_v27 = vpop.f32.mrb[1].mxu0 }
 0x150   :  { %v208_v28 = vpop.f32.mrb[2].mxu0 }
 0x151   :  { %v209_v29 = vadd.f32 %v459_v24, %v208_v28  ;;  %v533_v30 = vpop.f32.mrb[3].mxu0  ;;  %v212_v31 = vmax.f32 %v206_v26, 0.0 }
 0x153   :  { %v213_v32 = vmax.f32 %v209_v29, 0.0 }
 0x155   :  { %v214_v33 = vpack.c.bf16 %v213_v32, %v212_v31 }
 0x157   :  { %551 = vmatmul.mubr.bf16.vlgmr.msra.gmra.mrb[0].mxu1 %v214_v33 }
 0x22a   :  { %v318_v37 = vpop.f32.mrb[0].mxu1 }
 0x22b   :  { %v319_v38 = vadd.f32 %v469_v36, %v318_v37  ;;  %v552_v39 = vpop.f32.mrb[1].mxu1 }
 0x22c   :  { %v321_v40 = vpop.f32.mrb[2].mxu1 }
 0x22d   :  { %v322_v41 = vadd.f32 %v469_v36, %v321_v40  ;;  %v553_v42 = vpop.f32.mrb[3].mxu1  ;;  %v325_v43 = vmax.f32 %v319_v38, 0.0 }
 0x22f   :  { %v326_v44 = vmax.f32 %v322_v41, 0.0 }
 0x231   :  { %v327_v45 = vpack.c.bf16 %v326_v44, %v325_v43 }
 0x233   :  { %571 = vmatmul.mubr.bf16.vlgmr.msra.gmra.mrb[4].mxu0 %v327_v45 }
 0x306   :  { %v431_v47 = vpop.f32.mrb[4].mxu0 }
 0x307   :  { %v432_v48 = vadd.f32 %v478_v46, %v431_v47  ;;  %v572_v49 = vpop.f32.mrb[5].mxu0 }
 0x308   :  { %v434_v50 = vpop.f32.mrb[6].mxu0 }
 0x309   :  { %438 = vst [vmem:[#allocation11] sm:$0xff] %v432_v48  ;;  %v435_v51 = vadd.f32 %v478_v46, %v434_v50  ;;  %v573_v52 = vpop.f32.mrb[7].mxu0 }
 0x30b   :  { %439 = vst [vmem:[#allocation11 + $0x8] sm:$0xff] %v435_v51 }
 0x30c   :  { %732 = shalt.err (!%p729_p2)
}
 0x30d   :  { %s733_s19 = scalar_lea.hbm %s937_s7, 256 }
 0x30e   :  { %p734_p3 = scmp.ne.s32.totalorder %s937_s7, %s733_s19  ;;  %p737_p4 = scmp.lt.u32.totalorder %s733_s19, %s937_s7 }
 0x310   :  { %p739_p5 = pnand %p737_p4, %p734_p3 }
 0x312   :  { %742 = shalt.err (!%p739_p5)
}
 0x313   :  { %s761_s24 = smov 128   ;;  %s762_s1 = smov 8  }
 0x314   :  { %451 = dma.vmem_to_hbm [thread:$0]  %s446_s17, 256, %s937_s7, [#allocation4], %s761_s24, %s761_s24, %s762_s1  }
 0x315   :  { %749 = dma.done.wait [#allocation4], 256  }
 0x316   :  { %750 = vsyncadd [#allocation4], 4294967040 }
 0x317   :  { %455 = vsyncpa [#allocation3], 1 }
 0x318   :  { %456 = vsyncpa [#allocation6], 1 }
 0x319   :  { %457 = vsyncpa [#allocation9], 1 }
 0x31a   :  { %458 = vsyncpa [#allocation4], 1 }

// kernel: tpu_custom_call.1
= control target key start
LH: loop header
LB: loop body
LE: loop exit
PB: predicated region body
PF: predicated region fallthrough
CT: control target
= control target key end

     0   :  { %12 = vsyncpa [#allocation3], 0  ;;  %s930_s0 = inlined_call_operand.hbm [shape: bf16[16,128], index: 0, kind: input, shape index: {}]   ;;  %s931_s1 = inlined_call_operand.hbm [shape: bf16[128,128], index: 1, kind: input, shape index: {}]   ;;  %s932_s2 = inlined_call_operand.hbm [shape: f32[8,128], index: 2, kind: input, shape index: {}]   ;;  %s933_s3 = inlined_call_operand.hbm [shape: bf16[128,128], index: 3, kind: input, shape index: {}]   ;;  %s934_s4 = inlined_call_operand.vmem [shape: f32[8,128], index: 4, kind: input, shape index: {}]   ;;  %s935_s5 = inlined_call_operand.hbm [shape: bf16[128,128], index: 5, kind: input, shape index: {}]   ;;  %s936_s6 = inlined_call_operand.vmem [shape: f32[8,128], index: 6, kind: input, shape index: {}]   ;;  %s937_s7 = inlined_call_operand.hbm [shape: f32[16,128], index: 7, kind: output, shape index: {}]  }
   0x1   :  { %13 = vsyncpa [#allocation6], 0 }
   0x2   :  { %14 = vsyncpa [#allocation9], 0 }
   0x3   :  { %15 = vsyncpa [#allocation4], 0  ;;  %s751_s24 = smov [#allocation5]   ;;  %s752_s26 = smov [#allocation8]  }
   0x4   :  { %s33_s25 = sshll.u32 %s751_s24, 4  ;;  %s55_s27 = sshll.u32 %s752_s26, 4  ;;  %s34_s25 = int_to_ptr.vmem [resolvable:$true] %s33_s25  ;;  %s803_s27 = int_to_ptr.vmem [resolvable:$true] %s55_s27 }
   0x5   :  { %s611_s30 = scalar_lea.hbm %s931_s1, 1024 }
   0x6   :  { %p612_p0 = scmp.ne.s32.totalorder %s931_s1, %s611_s30  ;;  %p615_p1 = scmp.lt.u32.totalorder %s611_s30, %s931_s1 }
   0x8   :  { %p617_p2 = pnand %p615_p1, %p612_p0 }
   0xa   :  { %620 = shalt.err (!%p617_p2)
}
   0xb   :  { %s621_s12 = scalar_lea.vmem %s34_s25, 1024  ;;  %p626_p4 = scmp.lt.s32.totalorder %s34_s25, %s34_s25 }
   0xc   :  { %p622_p3 = scmp.ne.s32.totalorder %s34_s25, %s621_s12  ;;  %p627_p5 = scmp.lt.s32.totalorder %s621_s12, %s621_s12 }
   0xe   :  { %p628_p6 = por %p627_p5, %p626_p4 }
  0x10   :  { %p629_p7 = pnand %p628_p6, %p622_p3 }
  0x12   :  { %632 = shalt.err (!%p629_p7)
}
  0x13   :  { %s753_s13 = smov 64   ;;  %s754_s14 = smov 4  }
  0x14   :  { %39 = dma.hbm_to_vmem [thread:$0]  %s931_s1, 1024, %s34_s25, [#allocation6], %s753_s13, %s753_s13, %s754_s14  }
  0x15   :  { %s633_s19 = scalar_lea.hbm %s933_s3, 1024 }
  0x16   :  { %p634_p8 = scmp.ne.s32.totalorder %s933_s3, %s633_s19  ;;  %p637_p9 = scmp.lt.u32.totalorder %s633_s19, %s933_s3 }
  0x18   :  { %p639_p10 = pnand %p637_p9, %p634_p8 }
  0x1a   :  { %642 = shalt.err (!%p639_p10)
}
  0x1b   :  { %s643_s24 = scalar_lea.vmem %s803_s27, 1024  ;;  %p648_p12 = scmp.lt.s32.totalorder %s803_s27, %s803_s27 }
  0x1c   :  { %p644_p11 = scmp.ne.s32.totalorder %s803_s27, %s643_s24  ;;  %p649_p13 = scmp.lt.s32.totalorder %s643_s24, %s643_s24 }
  0x1e   :  { %p650_p0 = por %p649_p13, %p648_p12 }
  0x20   :  { %p651_p1 = pnand %p650_p0, %p644_p11 }
  0x22   :  { %654 = shalt.err (!%p651_p1)
}
  0x23   :  { %61 = dma.hbm_to_vmem [thread:$0]  %s933_s3, 1024, %s803_s27, [#allocation9], %s753_s13, %s753_s13, %s754_s14  }
  0x24   :  { %s755_s26 = smov [#allocation2]   ;;  %s756_s29 = smov [#allocation7]  }
  0x25   :  { %s21_s28 = sshll.u32 %s755_s26, 4  ;;  %s46_s30 = sshll.u32 %s756_s29, 4  ;;  %s22_s28 = int_to_ptr.vmem [resolvable:$true] %s21_s28  ;;  %s47_s30 = int_to_ptr.vmem [resolvable:$true] %s46_s30 }
  0x26   :  { %s655_s10 = scalar_lea.hbm %s930_s0, 128 }
  0x27   :  { %p656_p2 = scmp.ne.s32.totalorder %s930_s0, %s655_s10  ;;  %p659_p3 = scmp.lt.u32.totalorder %s655_s10, %s930_s0 }
  0x29   :  { %p661_p4 = pnand %p659_p3, %p656_p2 }
  0x2b   :  { %664 = shalt.err (!%p661_p4)
}
  0x2c   :  { %s665_s3 = scalar_lea.vmem %s22_s28, 128  ;;  %p670_p6 = scmp.lt.s32.totalorder %s22_s28, %s22_s28 }
  0x2d   :  { %p666_p5 = scmp.ne.s32.totalorder %s22_s28, %s665_s3  ;;  %p671_p7 = scmp.lt.s32.totalorder %s665_s3, %s665_s3 }
  0x2f   :  { %p672_p8 = por %p671_p7, %p670_p6 }
  0x31   :  { %p673_p9 = pnand %p672_p8, %p666_p5 }
  0x33   :  { %676 = shalt.err (!%p673_p9)
}
  0x34   :  { %27 = dma.hbm_to_vmem [thread:$0]  %s930_s0, 128, %s22_s28, [#allocation3], %s753_s13, %s753_s13, %s754_s14  }
  0x35   :  { %s677_s20 = scalar_lea.hbm %s932_s2, 128 }
  0x36   :  { %p678_p10 = scmp.ne.s32.totalorder %s932_s2, %s677_s20  ;;  %p681_p11 = scmp.lt.u32.totalorder %s677_s20, %s932_s2 }
  0x38   :  { %p683_p12 = pnand %p681_p11, %p678_p10 }
  0x3a   :  { %686 = shalt.err (!%p683_p12)
}
  0x3b   :  { %s687_s1 = scalar_lea.vmem %s47_s30, 128  ;;  %p692_p0 = scmp.lt.s32.totalorder %s47_s30, %s47_s30 }
  0x3c   :  { %p688_p13 = scmp.ne.s32.totalorder %s47_s30, %s687_s1  ;;  %p693_p1 = scmp.lt.s32.totalorder %s687_s1, %s687_s1 }
  0x3e   :  { %p694_p2 = por %p693_p1, %p692_p0 }
  0x40   :  { %p695_p3 = pnand %p694_p2, %p688_p13 }
  0x42   :  { %698 = shalt.err (!%p695_p3)
}
  0x43   :  { %49 = dma.hbm_to_vmem [thread:$0]  %s932_s2, 128, %s47_s30, [#allocation6]  }
  0x44   :  { %s757_s26 = smov [#allocation10]   ;;  %s699_s9 = scalar_lea.hbm %s935_s5, 1024 }
  0x45   :  { %s69_s28 = sshll.u32 %s757_s26, 4  ;;  %p700_p4 = scmp.ne.s32.totalorder %s935_s5, %s699_s9  ;;  %s70_s28 = int_to_ptr.vmem [resolvable:$true] %s69_s28 }
  0x46   :  { %p703_p5 = scmp.lt.u32.totalorder %s699_s9, %s935_s5 }
  0x48   :  { %p705_p6 = pnand %p703_p5, %p700_p4 }
  0x4a   :  { %708 = shalt.err (!%p705_p6)
}
  0x4b   :  { %s709_s16 = scalar_lea.vmem %s70_s28, 1024  ;;  %p714_p8 = scmp.lt.s32.totalorder %s70_s28, %s70_s28 }
  0x4c   :  { %p710_p7 = scmp.ne.s32.totalorder %s70_s28, %s709_s16  ;;  %p715_p9 = scmp.lt.s32.totalorder %s709_s16, %s709_s16 }
  0x4e   :  { %p716_p10 = por %p715_p9, %p714_p8 }
  0x50   :  { %p717_p11 = pnand %p716_p10, %p710_p7 }
  0x52   :  { %720 = shalt.err (!%p717_p11)
}
  0x53   :  { %75 = dma.hbm_to_vmem [thread:$0]  %s935_s5, 1024, %s70_s28, [#allocation9], %s753_s13, %s753_s13, %s754_s14  }
  0x54   :  { %743 = dma.done.wait [#allocation3], 128  }
  0x55   :  { %744 = vsyncadd [#allocation3], 4294967168 }
  0x56   :  { %745 = dma.done.wait [#allocation6], 1152  }
  0x57   :  { %746 = vsyncadd [#allocation6], 4294966144 }
  0x58   :  { %747 = dma.done.wait [#allocation9], 2048  }
  0x59   :  { %748 = vsyncadd [#allocation9], 4294965248  ;;  %v758_v0 = vmov 0.0   ;;  %vm759_vm0 = vmmov 0   ;;  %v586_v1 = vld [vmem:[#allocation5] sm:$0xff]   ;;  %v587_v2 = vld [vmem:[#allocation5 + $0x8] sm:$0xff]  }
  0x5a   :  { %514 = vmatprep.subr.bf16.mxu0 %v758_v0  ;;  %530 = vmatprep.mubr.msk.bf16.mxu0 %vm759_vm0, %v758_v0  ;;  %v588_v3 = vld [vmem:[#allocation5 + $0x10] sm:$0xff]   ;;  %v595_v4 = vld [vmem:[#allocation8] sm:$0xff]   ;;  %v589_v5 = vld [vmem:[#allocation5 + $0x18] sm:$0xff]   ;;  %s760_s27 = smov [#allocation11]  }
  0x5b   :  { %534 = vmatprep.subr.bf16.mxu1 %v758_v0  ;;  %550 = vmatprep.mubr.msk.bf16.mxu1 %vm759_vm0, %v758_v0  ;;  %v596_v6 = vld [vmem:[#allocation8 + $0x8] sm:$0xff]   ;;  %v590_v7 = vld [vmem:[#allocation5 + $0x20] sm:$0xff]   ;;  %v597_v8 = vld [vmem:[#allocation8 + $0x10] sm:$0xff]   ;;  %s445_s17 = sshll.u32 %s760_s27, 4  ;;  %s446_s17 = int_to_ptr.vmem [resolvable:$true] %s445_s17 }
  0x5c   :  { %515 = vmatpush3.bf16.msra.mxu0 %v586_v1  ;;  %535 = vmatpush3.bf16.msra.mxu1 %v595_v4  ;;  %v591_v9 = vld [vmem:[#allocation5 + $0x28] sm:$0xff]   ;;  %v598_v10 = vld [vmem:[#allocation8 + $0x18] sm:$0xff]   ;;  %v592_v11 = vld [vmem:[#allocation5 + $0x30] sm:$0xff]   ;;  %p726_p13 = scmp.lt.s32.totalorder %s446_s17, %s446_s17 }
  0x5d   :  { %516 = vmatprep.subr.bf16.mxu0 %v758_v0  ;;  %536 = vmatprep.subr.bf16.mxu1 %v758_v0  ;;  %v599_v12 = vld [vmem:[#allocation8 + $0x20] sm:$0xff]   ;;  %v593_v13 = vld [vmem:[#allocation5 + $0x38] sm:$0xff]   ;;  %v600_v14 = vld [vmem:[#allocation8 + $0x28] sm:$0xff]  }
  0x5e   :  { %v594_v15 = vld [vmem:[#allocation2] sm:$0xff]   ;;  %v602_v17 = vld [vmem:[#allocation8 + $0x38] sm:$0xff]   ;;  %v603_v18 = vld [vmem:[#allocation10] sm:$0xff]  }
  0x5f   :  { %v601_v16 = vld [vmem:[#allocation8 + $0x30] sm:$0xff]   ;;  %v604_v19 = vld [vmem:[#allocation10 + $0x8] sm:$0xff]   ;;  %v606_v21 = vld [vmem:[#allocation10 + $0x18] sm:$0xff]  }
  0x60   :  { %517 = vmatpush3.bf16.msra.mxu0 %v587_v2  ;;  %537 = vmatpush3.bf16.msra.mxu1 %v596_v6  ;;  %v605_v20 = vld [vmem:[#allocation10 + $0x10] sm:$0xff]   ;;  %v607_v22 = vld [vmem:[#allocation10 + $0x20] sm:$0xff]   ;;  %v608_v23 = vld [vmem:[#allocation10 + $0x28] sm:$0xff]  }
  0x61   :  { %518 = vmatprep.subr.bf16.mxu0 %v758_v0  ;;  %538 = vmatprep.subr.bf16.mxu1 %v758_v0  ;;  %v459_v24 = vld [vmem:[#allocation7] ss:$0 sm:$0xff]  ;;  %v609_v34 = vld [vmem:[#allocation10 + $0x30] sm:$0xff]  }
  0x62   :  { %v610_v35 = vld [vmem:[#allocation10 + $0x38] sm:$0xff]   ;;  %v469_v36 = vld [vmem:[%s934_s4] ss:$0 sm:$0xff]  ;;  %s721_s4 = scalar_lea.vmem %s446_s17, 256 }
  0x63   :  { %v478_v46 = vld [vmem:[%s936_s6] ss:$0 sm:$0xff]  ;;  %p722_p12 = scmp.ne.s32.totalorder %s446_s17, %s721_s4  ;;  %p727_p0 = scmp.lt.s32.totalorder %s721_s4, %s721_s4 }
  0x64   :  { %519 = vmatpush3.bf16.msra.mxu0 %v588_v3  ;;  %539 = vmatpush3.bf16.msra.mxu1 %v597_v8 }
  0x65   :  { %520 = vmatprep.subr.bf16.mxu0 %v758_v0  ;;  %540 = vmatprep.subr.bf16.mxu1 %v758_v0  ;;  %p728_p1 = por %p727_p0, %p726_p13 }
  0x67   :  { %p729_p2 = pnand %p728_p1, %p722_p12 }
  0x68   :  { %521 = vmatpush3.bf16.msra.mxu0 %v589_v5  ;;  %541 = vmatpush3.bf16.msra.mxu1 %v598_v10 }
  0x69   :  { %522 = vmatprep.subr.bf16.mxu0 %v758_v0  ;;  %542 = vmatprep.subr.bf16.mxu1 %v758_v0 }
  0x6c   :  { %523 = vmatpush3.bf16.msra.mxu0 %v590_v7  ;;  %543 = vmatpush3.bf16.msra.mxu1 %v599_v12 }
  0x6d   :  { %524 = vmatprep.subr.bf16.mxu0 %v758_v0  ;;  %544 = vmatprep.subr.bf16.mxu1 %v758_v0 }
  0x70   :  { %525 = vmatpush3.bf16.msra.mxu0 %v591_v9  ;;  %545 = vmatpush3.bf16.msra.mxu1 %v600_v14 }
  0x71   :  { %526 = vmatprep.subr.bf16.mxu0 %v758_v0  ;;  %546 = vmatprep.subr.bf16.mxu1 %v758_v0 }
  0x74   :  { %527 = vmatpush3.bf16.msra.mxu0 %v592_v11  ;;  %547 = vmatpush3.bf16.msra.mxu1 %v601_v16 }
  0x75   :  { %528 = vmatprep.subr.bf16.mxu0 %v758_v0  ;;  %548 = vmatprep.subr.bf16.mxu1 %v758_v0 }
  0x78   :  { %529 = vmatpush3.bf16.msra.mxu0 %v593_v13  ;;  %549 = vmatpush3.bf16.msra.mxu1 %v602_v17 }
  0x79   :  { %554 = vmatprep.subr.bf16.mxu0 %v758_v0 }
  0x7b   :  { %531 = vmatmul.mubr.bf16.vlgmr.msra.gmra.mrb[0].mxu0 %v594_v15 }
  0x7c   :  { %570 = vmatprep.mubr.msk.bf16.mxu0 %vm759_vm0, %v758_v0  ;;  %555 = vmatpush3.bf16.msra.mxu0 %v603_v18 }
  0x7d   :  { %556 = vmatprep.subr.bf16.mxu0 %v758_v0 }
  0x80   :  { %557 = vmatpush3.bf16.msra.mxu0 %v604_v19 }
  0x81   :  { %558 = vmatprep.subr.bf16.mxu0 %v758_v0 }
  0x84   :  { %559 = vmatpush3.bf16.msra.mxu0 %v605_v20 }
  0x85   :  { %560 = vmatprep.subr.bf16.mxu0 %v758_v0 }
  0x88   :  { %561 = vmatpush3.bf16.msra.mxu0 %v606_v21 }
  0x89   :  { %562 = vmatprep.subr.bf16.mxu0 %v758_v0 }
  0x8c   :  { %563 = vmatpush3.bf16.msra.mxu0 %v607_v22 }
  0x8d   :  { %564 = vmatprep.subr.bf16.mxu0 %v758_v0 }
  0x90   :  { %565 = vmatpush3.bf16.msra.mxu0 %v608_v23 }
  0x91   :  { %566 = vmatprep.subr.bf16.mxu0 %v758_v0 }
  0x94   :  { %567 = vmatpush3.bf16.msra.mxu0 %v609_v34 }
  0x95   :  { %568 = vmatprep.subr.bf16.mxu0 %v758_v0 }
  0x98   :  { %569 = vmatpush3.bf16.msra.mxu0 %v610_v35 }
 0x14e   :  { %v205_v25 = vpop.f32.mrb[0].mxu0 }
 0x14f   :  { %v206_v26 = vadd.f32 %v459_v24, %v205_v25  ;;  %v532_v27 = vpop.f32.mrb[1].mxu0 }
 0x150   :  { %v208_v28 = vpop.f32.mrb[2].mxu0 }
 0x151   :  { %v209_v29 = vadd.f32 %v459_v24, %v208_v28  ;;  %v533_v30 = vpop.f32.mrb[3].mxu0  ;;  %v212_v31 = vmax.f32 %v206_v26, 0.0 }
 0x153   :  { %v213_v32 = vmax.f32 %v209_v29, 0.0 }
 0x155   :  { %v214_v33 = vpack.c.bf16 %v213_v32, %v212_v31 }
 0x157   :  { %551 = vmatmul.mubr.bf16.vlgmr.msra.gmra.mrb[0].mxu1 %v214_v33 }
 0x22a   :  { %v318_v37 = vpop.f32.mrb[0].mxu1 }
 0x22b   :  { %v319_v38 = vadd.f32 %v469_v36, %v318_v37  ;;  %v552_v39 = vpop.f32.mrb[1].mxu1 }
 0x22c   :  { %v321_v40 = vpop.f32.mrb[2].mxu1 }
 0x22d   :  { %v322_v41 = vadd.f32 %v469_v36, %v321_v40  ;;  %v553_v42 = vpop.f32.mrb[3].mxu1  ;;  %v325_v43 = vmax.f32 %v319_v38, 0.0 }
 0x22f   :  { %v326_v44 = vmax.f32 %v322_v41, 0.0 }
 0x231   :  { %v327_v45 = vpack.c.bf16 %v326_v44, %v325_v43 }
 0x233   :  { %571 = vmatmul.mubr.bf16.vlgmr.msra.gmra.mrb[4].mxu0 %v327_v45 }
 0x306   :  { %v431_v47 = vpop.f32.mrb[4].mxu0 }
 0x307   :  { %v432_v48 = vadd.f32 %v478_v46, %v431_v47  ;;  %v572_v49 = vpop.f32.mrb[5].mxu0 }
 0x308   :  { %v434_v50 = vpop.f32.mrb[6].mxu0 }
 0x309   :  { %438 = vst [vmem:[#allocation11] sm:$0xff] %v432_v48  ;;  %v435_v51 = vadd.f32 %v478_v46, %v434_v50  ;;  %v573_v52 = vpop.f32.mrb[7].mxu0 }
 0x30b   :  { %439 = vst [vmem:[#allocation11 + $0x8] sm:$0xff] %v435_v51 }
 0x30c   :  { %732 = shalt.err (!%p729_p2)
}
 0x30d   :  { %s733_s19 = scalar_lea.hbm %s937_s7, 256 }
 0x30e   :  { %p734_p3 = scmp.ne.s32.totalorder %s937_s7, %s733_s19  ;;  %p737_p4 = scmp.lt.u32.totalorder %s733_s19, %s937_s7 }
 0x310   :  { %p739_p5 = pnand %p737_p4, %p734_p3 }
 0x312   :  { %742 = shalt.err (!%p739_p5)
}
 0x313   :  { %s761_s24 = smov 128   ;;  %s762_s1 = smov 8  }
 0x314   :  { %451 = dma.vmem_to_hbm [thread:$0]  %s446_s17, 256, %s937_s7, [#allocation4], %s761_s24, %s761_s24, %s762_s1  }
 0x315   :  { %749 = dma.done.wait [#allocation4], 256  }
 0x316   :  { %750 = vsyncadd [#allocation4], 4294967040 }
 0x317   :  { %455 = vsyncpa [#allocation3], 1 }
 0x318   :  { %456 = vsyncpa [#allocation6], 1 }
 0x319   :  { %457 = vsyncpa [#allocation9], 1 }
 0x31a   :  { %458 = vsyncpa [#allocation4], 1 }

</bundles_post_ra>
